<compile_context>
chip_gen: v6e
topology: v6e:2x2x1
jax: 0.10.0
libtpu: 0.0.40
codegen_flags: <defaults>
</compile_context>

<pallas_src>
import functools

import jax
import jax.numpy as jnp
from jax.experimental import pallas as pl
from jax.experimental.pallas import tpu as pltpu


def _round_up(x, m):
    return ((x + m - 1) // m) * m


def _yolo_loss_kernel(pred_ref, targ_ref, out_ref, acc_ref, *, valid_last):
    """pred_ref: (30, TM), targ_ref: (25, TM); channels on sublanes, cells on lanes."""
    i = pl.program_id(0)
    last = pl.num_programs(0) - 1
    tm = acc_ref.shape[1]
    f32 = jnp.float32

    @pl.when(i == 0)
    def _init():
        acc_ref[...] = jnp.zeros_like(acc_ref)

    # ---- channel-group loads: ref slices, short live ranges ----
    exists = targ_ref[20:21, :].astype(f32)          # objectness / target conf (1, TM)
    tb     = targ_ref[21:25, :].astype(f32)          # target box   (cx,cy,w,h) (4, TM)
    pb1    = pred_ref[21:25, :].astype(f32)          # predicted box 1          (4, TM)
    pb2    = pred_ref[26:30, :].astype(f32)          # predicted box 2          (4, TM)
    conf1  = pred_ref[20:21, :].astype(f32)
    conf2  = pred_ref[25:26, :].astype(f32)

    # ---- IoU(pb1, tb) and IoU(pb2, tb): joint corner/intersection chain on a
    #      stacked (4, TM) block: centers [x1,y1,x2,y2], sizes [w1,h1,w2,h2] ----
    t_lo = tb[0:2, :] - 0.5 * tb[2:4, :]
    t_hi = tb[0:2, :] + 0.5 * tb[2:4, :]
    t_lo2 = jnp.concatenate([t_lo, t_lo], axis=0)    # (4, TM)
    t_hi2 = jnp.concatenate([t_hi, t_hi], axis=0)
    pc = jnp.concatenate([pb1[0:2, :], pb2[0:2, :]], axis=0)
    ps = jnp.concatenate([pb1[2:4, :], pb2[2:4, :]], axis=0)
    p_lo = pc - 0.5 * ps
    p_hi = pc + 0.5 * ps
    d = jnp.maximum(jnp.minimum(p_hi, t_hi2) - jnp.maximum(p_lo, t_lo2), 0.0)
    inter1 = d[0:1, :] * d[1:2, :]
    inter2 = d[2:3, :] * d[3:4, :]
    area_t = tb[2:3, :] * tb[3:4, :]
    area1 = pb1[2:3, :] * pb1[3:4, :]
    area2 = pb2[2:3, :] * pb2[3:4, :]
    # NOTE: no epsilon in the denominator, matching the PyTorch IoU() exactly
    # (degenerate boxes -> NaN -> `best` falls back to box 1, same as reference).
    iou1 = inter1 / (area1 + area_t - inter1)
    iou2 = inter2 / (area2 + area_t - inter2)
    best = iou2 > iou1                               # ties -> box 1 (torch.max picks idx 0)

    # ---- box coordinate residuals (lambda_coord = 5.0) ----
    box_pred = jnp.where(best, pb2, pb1) * exists    # (4, TM)
    box_tgt = tb * exists
    wh = box_pred[2:4, :]
    sign = jnp.where(wh > 0.0, 1.0, jnp.where(wh < 0.0, -1.0, 0.0))
    r_xy = box_pred[0:2, :] - box_tgt[0:2, :]
    r_wh = sign * jnp.sqrt(jnp.abs(wh + 1e-6)) - jnp.sqrt(box_tgt[2:4, :])

    # ---- confidence residuals (target conf row == exists row) ----
    not_exists = 1.0 - exists
    r_obj = exists * (jnp.where(best, conf2, conf1) - exists)     # weight 1.0
    r_no1 = not_exists * (conf1 - exists)                          # weight 0.5
    r_no2 = not_exists * (conf2 - exists)                          # weight 0.5

    # ---- class residuals (weight 1.0) ----
    r_cls = exists * (pred_ref[0:20, :].astype(f32) - targ_ref[0:20, :].astype(f32))

    # ---- fused weighted per-lane loss ----
    per_lane = (
        5.0 * (jnp.sum(r_xy * r_xy, axis=0, keepdims=True)
               + jnp.sum(r_wh * r_wh, axis=0, keepdims=True))
        + r_obj * r_obj
        + 0.5 * (r_no1 * r_no1 + r_no2 * r_no2)
        + jnp.sum(r_cls * r_cls, axis=0, keepdims=True)
    )                                                              # (1, TM)

    if valid_last < tm:
        # Tail lanes of the last block are stale VMEM: mask with `where` (NOT a
        # multiply) so NaN/Inf garbage cannot poison the sum. Full tiles skip
        # this entirely at runtime.
        @pl.when(i != last)
        def _acc_full():
            acc_ref[...] += per_lane

        @pl.when(i == last)
        def _acc_tail():
            lane = jax.lax.broadcasted_iota(jnp.int32, (1, tm), 1)
            acc_ref[...] += jnp.where(lane < valid_last, per_lane, 0.0)
    else:
        acc_ref[...] += per_lane

    @pl.when(i == last)
    def _finalize():
        out_ref[0, 0] = jnp.sum(acc_ref[...])


@functools.partial(jax.jit, static_argnames=("tile_m",))
def yolo_loss_channel_major(pred_cm, targ_cm, tile_m=16384):
    """pred_cm: (C+5B, M) channel-major; targ_cm: (C+5, M). Returns scalar loss.

    Zero-relayout entry point: a producer that emits channel-major activations
    (free to arrange in the final dense layer) pays no transpose pass at all.
    """
    fp, m = pred_cm.shape
    ft = targ_cm.shape[0]

    # Lane-multiple tile; single block for small M, big tiles otherwise.
    tm = min(_round_up(tile_m, 128), _round_up(m, 128))
    grid_m = pl.cdiv(m, tm)
    valid_last = m - (grid_m - 1) * tm   # static: valid lanes in the last block

    kernel = functools.partial(_yolo_loss_kernel, valid_last=valid_last)
    out = pl.pallas_call(
        kernel,
        out_shape=jax.ShapeDtypeStruct((1, 1), jnp.float32),
        grid_spec=pltpu.PrefetchScalarGridSpec(
            num_scalar_prefetch=0,
            grid=(grid_m,),
            in_specs=[
                pl.BlockSpec((fp, tm), lambda i: (0, i)),
                pl.BlockSpec((ft, tm), lambda i: (0, i)),
            ],
            out_specs=pl.BlockSpec(memory_space=pltpu.MemorySpace.SMEM),
            scratch_shapes=[pltpu.VMEM((1, tm), jnp.float32)],
        ),
        compiler_params=pltpu.CompilerParams(
            # M is a pure reduction into the resident accumulator.
            dimension_semantics=("arbitrary",),
            vmem_limit_bytes=32 * 1024 * 1024,   # ample: ~9 MiB used at tm=16384
        ),
    )(pred_cm, targ_cm)
    return out[0, 0]


@functools.partial(jax.jit, static_argnames=("S", "B", "C", "tile_m"))
def yolo_loss(predictions, target, S=7, B=2, C=20, tile_m=16384):
    """predictions: (N, S*S*(C+5B)); target: (N, S*S*(C+5)). Returns scalar loss."""
    fp = C + 5 * B   # 30
    ft = C + 5       # 25
    # TODO(synk): this transpose costs one extra HBM read+write pass over the
    # inputs; emit the detection head's output channel-major and call
    # yolo_loss_channel_major directly to remove it.
    p = jnp.reshape(predictions, (-1, fp)).T   # (30, M), cells on lanes
    t = jnp.reshape(target, (-1, ft)).T        # (25, M)
    return yolo_loss_channel_major(p, t, tile_m=tile_m)


def yolo_loss_ref(predictions, target, S=7, B=2, C=20):
    """Pure-JAX reference mirroring the PyTorch forward."""
    p = jnp.reshape(predictions, (-1, S, S, C + 5 * B)).astype(jnp.float32)
    t = jnp.reshape(target, (-1, S, S, C + 5)).astype(jnp.float32)

    def iou(b1, b2):
        xmin1, ymin1 = b1[..., 0] - b1[..., 2] / 2, b1[..., 1] - b1[..., 3] / 2
        xmax1, ymax1 = b1[..., 0] + b1[..., 2] / 2, b1[..., 1] + b1[..., 3] / 2
        xmin2, ymin2 = b2[..., 0] - b2[..., 2] / 2, b2[..., 1] - b2[..., 3] / 2
        xmax2, ymax2 = b2[..., 0] + b2[..., 2] / 2, b2[..., 1] + b2[..., 3] / 2
        iw = jnp.maximum(jnp.minimum(xmax1, xmax2) - jnp.maximum(xmin1, xmin2), 0.0)
        ih = jnp.maximum(jnp.minimum(ymax1, ymax2) - jnp.maximum(ymin1, ymin2), 0.0)
        inter = iw * ih
        return inter / (b1[..., 2] * b1[..., 3] + b2[..., 2] * b2[..., 3] - inter)

    iou1 = iou(p[..., 21:25], t[..., 21:25])
    iou2 = iou(p[..., 26:30], t[..., 21:25])
    best = (iou2 > iou1).astype(jnp.float32)[..., None]
    exists = t[..., 20:21]

    box_pred = exists * (best * p[..., 26:30] + (1.0 - best) * p[..., 21:25])
    box_tgt = exists * t[..., 21:25]
    wh = box_pred[..., 2:4]
    wh_pred = jnp.sign(wh) * jnp.sqrt(jnp.abs(wh + 1e-6))
    box_pred = jnp.concatenate([box_pred[..., 0:2], wh_pred], axis=-1)
    box_tgt = jnp.concatenate([box_tgt[..., 0:2], jnp.sqrt(box_tgt[..., 2:4])], axis=-1)
    box_loss = jnp.sum((box_pred - box_tgt) ** 2)

    pred_box = best * p[..., 25:26] + (1.0 - best) * p[..., 20:21]
    object_loss = jnp.sum((exists * pred_box - exists * t[..., 20:21]) ** 2)

    no_obj = jnp.sum(((1 - exists) * p[..., 20:21] - (1 - exists) * t[..., 20:21]) ** 2)
    no_obj += jnp.sum(((1 - exists) * p[..., 25:26] - (1 - exists) * t[..., 20:21]) ** 2)

    class_loss = jnp.sum((exists * p[..., :20] - exists * t[..., :20]) ** 2)
    return 5.0 * box_loss + object_loss + 0.5 * no_obj + class_loss


if __name__ == "__main__":
    S, B, C = 7, 2, 20
    key = jax.random.PRNGKey(0)

    def make_inputs(k, n):
        kp, kc, ke, kb = jax.random.split(k, 4)
        preds = jax.random.normal(kp, (n, S * S * (C + 5 * B)), dtype=jnp.float32)
        classes = jax.random.uniform(kc, (n, S, S, C), dtype=jnp.float32)
        exists = (jax.random.uniform(ke, (n, S, S, 1)) > 0.5).astype(jnp.float32)
        boxes = jax.random.uniform(kb, (n, S, S, 4), minval=0.05, maxval=0.95,
                                   dtype=jnp.float32)
        targ = jnp.concatenate([classes, exists, boxes], axis=-1).reshape(n, -1)
        return preds, targ

    # (batch, tile_m): single-block small case; multi-block with tail masking;
    # exact-multiple case exercising the unmasked accumulate path.
    for n, tile_m in ((2, 16384), (48, 1024), (128, 896)):
        preds, targ = make_inputs(jax.random.fold_in(key, n), n)
        loss = jax.block_until_ready(yolo_loss(preds, targ, S=S, B=B, C=C, tile_m=tile_m))
        ref = yolo_loss_ref(preds, targ, S=S, B=B, C=C)
        assert jnp.allclose(loss, ref, rtol=1e-4, atol=1e-3), (n, float(loss), float(ref))

    print("KERNEL_OK")
</pallas_src>

<mosaic_0001>
module attributes {stable_mosaic.version = 11 : i64} {
  func.func @_yolo_loss_kernel(%arg0: i32, %arg1: memref<30x128xf32, #tpu.memory_space<vmem>>, %arg2: memref<25x128xf32, #tpu.memory_space<vmem>>, %arg3: memref<1x1xf32, #tpu.memory_space<smem>>, %arg4: memref<1x128xf32, #tpu.memory_space<vmem>>) attributes {dimension_semantics = [#tpu.dimension_semantics<arbitrary>], iteration_bounds = array<i64: 1>, scalar_prefetch = 0 : i64, scratch_operands = 1 : i64, tpu.core_type = #tpu.core_type<tc>, window_params = [{transform_indices = @transform_0, window_bounds = array<i64: 30, 128>}, {transform_indices = @transform_1, window_bounds = array<i64: 25, 128>}, {transform_indices = @transform_2, window_bounds = array<i64: 1, 1>}]} {
    %c0_i32 = arith.constant 0 : i32
    %0 = arith.cmpi eq, %arg0, %c0_i32 : i32
    %1 = arith.extui %0 : i1 to i32
    %c0_i32_0 = arith.constant 0 : i32
    %2 = arith.cmpi ne, %1, %c0_i32_0 : i32
    scf.if %2 {
      %cst_34 = arith.constant 0.000000e+00 : f32
      %132 = vector.broadcast %cst_34 : f32 to vector<1x128xf32>
      %c0_35 = arith.constant 0 : index
      %c0_36 = arith.constant 0 : index
      %133 = vector.load %arg4[%c0_35, %c0_36] : memref<1x128xf32, #tpu.memory_space<vmem>>, vector<1x128xf32>
      tpu.vector_store %arg4[%c0_35, %c0_36], %132 {strides = array<i32>} : memref<1x128xf32, #tpu.memory_space<vmem>>, vector<1x128xf32>,
    } else {
    }
    %c20 = arith.constant 20 : index
    %c0 = arith.constant 0 : index
    %3 = vector.load %arg2[%c20, %c0] : memref<25x128xf32, #tpu.memory_space<vmem>>, vector<1x128xf32>
    %c21 = arith.constant 21 : index
    %c0_1 = arith.constant 0 : index
    %4 = vector.load %arg2[%c21, %c0_1] : memref<25x128xf32, #tpu.memory_space<vmem>>, vector<4x128xf32>
    %c21_2 = arith.constant 21 : index
    %c0_3 = arith.constant 0 : index
    %5 = vector.load %arg1[%c21_2, %c0_3] : memref<30x128xf32, #tpu.memory_space<vmem>>, vector<4x128xf32>
    %c26 = arith.constant 26 : index
    %c0_4 = arith.constant 0 : index
    %6 = vector.load %arg1[%c26, %c0_4] : memref<30x128xf32, #tpu.memory_space<vmem>>, vector<4x128xf32>
    %c20_5 = arith.constant 20 : index
    %c0_6 = arith.constant 0 : index
    %7 = vector.load %arg1[%c20_5, %c0_6] : memref<30x128xf32, #tpu.memory_space<vmem>>, vector<1x128xf32>
    %c25 = arith.constant 25 : index
    %c0_7 = arith.constant 0 : index
    %8 = vector.load %arg1[%c25, %c0_7] : memref<30x128xf32, #tpu.memory_space<vmem>>, vector<1x128xf32>
    %9 = vector.extract_strided_slice %4 {offsets = [0, 0], sizes = [2, 128], strides = [1, 1]} : vector<4x128xf32> to vector<2x128xf32>
    %10 = vector.extract_strided_slice %4 {offsets = [2, 0], sizes = [2, 128], strides = [1, 1]} : vector<4x128xf32> to vector<2x128xf32>
    %cst = arith.constant 5.000000e-01 : f32
    %11 = vector.broadcast %cst : f32 to vector<2x128xf32>
    %12 = arith.mulf %11, %10 : vector<2x128xf32>
    %13 = arith.subf %9, %12 : vector<2x128xf32>
    %14 = vector.extract_strided_slice %4 {offsets = [0, 0], sizes = [2, 128], strides = [1, 1]} : vector<4x128xf32> to vector<2x128xf32>
    %15 = vector.extract_strided_slice %4 {offsets = [2, 0], sizes = [2, 128], strides = [1, 1]} : vector<4x128xf32> to vector<2x128xf32>
    %cst_8 = arith.constant 5.000000e-01 : f32
    %16 = vector.broadcast %cst_8 : f32 to vector<2x128xf32>
    %17 = arith.mulf %16, %15 : vector<2x128xf32>
    %18 = arith.addf %14, %17 : vector<2x128xf32>
    %19 = tpu.concatenate %13, %13 in 0 : vector<2x128xf32>, vector<2x128xf32> -> vector<4x128xf32>
    %20 = tpu.concatenate %18, %18 in 0 : vector<2x128xf32>, vector<2x128xf32> -> vector<4x128xf32>
    %21 = vector.extract_strided_slice %5 {offsets = [0, 0], sizes = [2, 128], strides = [1, 1]} : vector<4x128xf32> to vector<2x128xf32>
    %22 = vector.extract_strided_slice %6 {offsets = [0, 0], sizes = [2, 128], strides = [1, 1]} : vector<4x128xf32> to vector<2x128xf32>
    %23 = tpu.concatenate %21, %22 in 0 : vector<2x128xf32>, vector<2x128xf32> -> vector<4x128xf32>
    %24 = vector.extract_strided_slice %5 {offsets = [2, 0], sizes = [2, 128], strides = [1, 1]} : vector<4x128xf32> to vector<2x128xf32>
    %25 = vector.extract_strided_slice %6 {offsets = [2, 0], sizes = [2, 128], strides = [1, 1]} : vector<4x128xf32> to vector<2x128xf32>
    %26 = tpu.concatenate %24, %25 in 0 : vector<2x128xf32>, vector<2x128xf32> -> vector<4x128xf32>
    %cst_9 = arith.constant 5.000000e-01 : f32
    %27 = vector.broadcast %cst_9 : f32 to vector<4x128xf32>
    %28 = arith.mulf %27, %26 : vector<4x128xf32>
    %29 = arith.subf %23, %28 : vector<4x128xf32>
    %cst_10 = arith.constant 5.000000e-01 : f32
    %30 = vector.broadcast %cst_10 : f32 to vector<4x128xf32>
    %31 = arith.mulf %30, %26 : vector<4x128xf32>
    %32 = arith.addf %23, %31 : vector<4x128xf32>
    %33 = arith.minimumf %32, %20 : vector<4x128xf32>
    %34 = arith.maximumf %29, %19 : vector<4x128xf32>
    %35 = arith.subf %33, %34 : vector<4x128xf32>
    %cst_11 = arith.constant 0.000000e+00 : f32
    %36 = vector.broadcast %cst_11 : f32 to vector<4x128xf32>
    %37 = arith.maximumf %35, %36 : vector<4x128xf32>
    %38 = vector.extract_strided_slice %37 {offsets = [0, 0], sizes = [1, 128], strides = [1, 1]} : vector<4x128xf32> to vector<1x128xf32>
    %39 = vector.extract_strided_slice %37 {offsets = [1, 0], sizes = [1, 128], strides = [1, 1]} : vector<4x128xf32> to vector<1x128xf32>
    %40 = arith.mulf %38, %39 : vector<1x128xf32>
    %41 = vector.extract_strided_slice %37 {offsets = [2, 0], sizes = [1, 128], strides = [1, 1]} : vector<4x128xf32> to vector<1x128xf32>
    %42 = vector.extract_strided_slice %37 {offsets = [3, 0], sizes = [1, 128], strides = [1, 1]} : vector<4x128xf32> to vector<1x128xf32>
    %43 = arith.mulf %41, %42 : vector<1x128xf32>
    %44 = vector.extract_strided_slice %4 {offsets = [2, 0], sizes = [1, 128], strides = [1, 1]} : vector<4x128xf32> to vector<1x128xf32>
    %45 = vector.extract_strided_slice %4 {offsets = [3, 0], sizes = [1, 128], strides = [1, 1]} : vector<4x128xf32> to vector<1x128xf32>
    %46 = arith.mulf %44, %45 : vector<1x128xf32>
    %47 = vector.extract_strided_slice %5 {offsets = [2, 0], sizes = [1, 128], strides = [1, 1]} : vector<4x128xf32> to vector<1x128xf32>
    %48 = vector.extract_strided_slice %5 {offsets = [3, 0], sizes = [1, 128], strides = [1, 1]} : vector<4x128xf32> to vector<1x128xf32>
    %49 = arith.mulf %47, %48 : vector<1x128xf32>
    %50 = vector.extract_strided_slice %6 {offsets = [2, 0], sizes = [1, 128], strides = [1, 1]} : vector<4x128xf32> to vector<1x128xf32>
    %51 = vector.extract_strided_slice %6 {offsets = [3, 0], sizes = [1, 128], strides = [1, 1]} : vector<4x128xf32> to vector<1x128xf32>
    %52 = arith.mulf %50, %51 : vector<1x128xf32>
    %53 = arith.addf %49, %46 : vector<1x128xf32>
    %54 = arith.subf %53, %40 : vector<1x128xf32>
    %55 = arith.divf %40, %54 : vector<1x128xf32>
    %56 = arith.addf %52, %46 : vector<1x128xf32>
    %57 = arith.subf %56, %43 : vector<1x128xf32>
    %58 = arith.divf %43, %57 : vector<1x128xf32>
    %59 = arith.cmpf ogt, %58, %55 : vector<1x128xf32>
    %60 = vector.shape_cast %59 : vector<1x128xi1> to vector<1x128xi1>
    %61 = vector.broadcast %60 : vector<1x128xi1> to vector<4x128xi1>
    %62 = arith.select %61, %6, %5 : vector<4x128xi1>, vector<4x128xf32>
    %63 = vector.broadcast %3 : vector<1x128xf32> to vector<4x128xf32>
    %64 = arith.mulf %62, %63 : vector<4x128xf32>
    %65 = vector.broadcast %3 : vector<1x128xf32> to vector<4x128xf32>
    %66 = arith.mulf %4, %65 : vector<4x128xf32>
    %67 = vector.extract_strided_slice %64 {offsets = [2, 0], sizes = [2, 128], strides = [1, 1]} : vector<4x128xf32> to vector<2x128xf32>
    %cst_12 = arith.constant 0.000000e+00 : f32
    %68 = vector.broadcast %cst_12 : f32 to vector<2x128xf32>
    %69 = arith.cmpf ogt, %67, %68 : vector<2x128xf32>
    %cst_13 = arith.constant 0.000000e+00 : f32
    %70 = vector.broadcast %cst_13 : f32 to vector<2x128xf32>
    %71 = arith.cmpf olt, %67, %70 : vector<2x128xf32>
    %cst_14 = arith.constant -1.000000e+00 : f32
    %cst_15 = arith.constant 0.000000e+00 : f32
    %72 = vector.broadcast %cst_14 : f32 to vector<2x128xf32>
    %73 = vector.broadcast %cst_15 : f32 to vector<2x128xf32>
    %74 = arith.select %71, %72, %73 : vector<2x128xi1>, vector<2x128xf32>
    %cst_16 = arith.constant 1.000000e+00 : f32
    %75 = vector.broadcast %cst_16 : f32 to vector<2x128xf32>
    %76 = arith.select %69, %75, %74 : vector<2x128xi1>, vector<2x128xf32>
    %77 = vector.extract_strided_slice %64 {offsets = [0, 0], sizes = [2, 128], strides = [1, 1]} : vector<4x128xf32> to vector<2x128xf32>
    %78 = vector.extract_strided_slice %66 {offsets = [0, 0], sizes = [2, 128], strides = [1, 1]} : vector<4x128xf32> to vector<2x128xf32>
    %79 = arith.subf %77, %78 : vector<2x128xf32>
    %cst_17 = arith.constant 9.99999997E-7 : f32
    %80 = vector.broadcast %cst_17 : f32 to vector<2x128xf32>
    %81 = arith.addf %67, %80 : vector<2x128xf32>
    %82 = math.absf %81 : vector<2x128xf32>
    %83 = math.sqrt %82 : vector<2x128xf32>
    %84 = arith.mulf %76, %83 : vector<2x128xf32>
    %85 = vector.extract_strided_slice %66 {offsets = [2, 0], sizes = [2, 128], strides = [1, 1]} : vector<4x128xf32> to vector<2x128xf32>
    %86 = math.sqrt %85 : vector<2x128xf32>
    %87 = arith.subf %84, %86 : vector<2x128xf32>
    %cst_18 = arith.constant 1.000000e+00 : f32
    %88 = vector.broadcast %cst_18 : f32 to vector<1x128xf32>
    %89 = arith.subf %88, %3 : vector<1x128xf32>
    %90 = arith.select %59, %8, %7 : vector<1x128xi1>, vector<1x128xf32>
    %91 = arith.subf %90, %3 : vector<1x128xf32>
    %92 = arith.mulf %3, %91 : vector<1x128xf32>
    %93 = arith.subf %7, %3 : vector<1x128xf32>
    %94 = arith.mulf %89, %93 : vector<1x128xf32>
    %95 = arith.subf %8, %3 : vector<1x128xf32>
    %96 = arith.mulf %89, %95 : vector<1x128xf32>
    %c0_19 = arith.constant 0 : index
    %c0_20 = arith.constant 0 : index
    %97 = vector.load %arg1[%c0_19, %c0_20] : memref<30x128xf32, #tpu.memory_space<vmem>>, vector<20x128xf32>
    %c0_21 = arith.constant 0 : index
    %c0_22 = arith.constant 0 : index
    %98 = vector.load %arg2[%c0_21, %c0_22] : memref<25x128xf32, #tpu.memory_space<vmem>>, vector<20x128xf32>
    %99 = arith.subf %97, %98 : vector<20x128xf32>
    %100 = vector.broadcast %3 : vector<1x128xf32> to vector<20x128xf32>
    %101 = arith.mulf %100, %99 : vector<20x128xf32>
    %102 = arith.mulf %79, %79 : vector<2x128xf32>
    %cst_23 = arith.constant dense<0.000000e+00> : vector<128xf32>
    %103 = vector.multi_reduction <add>, %102, %cst_23 [0] : vector<2x128xf32> to vector<128xf32>
    %104 = vector.shape_cast %103 : vector<128xf32> to vector<1x128xf32>
    %105 = arith.mulf %87, %87 : vector<2x128xf32>
    %cst_24 = arith.constant dense<0.000000e+00> : vector<128xf32>
    %106 = vector.multi_reduction <add>, %105, %cst_24 [0] : vector<2x128xf32> to vector<128xf32>
    %107 = vector.shape_cast %106 : vector<128xf32> to vector<1x128xf32>
    %108 = arith.addf %104, %107 : vector<1x128xf32>
    %cst_25 = arith.constant 5.000000e+00 : f32
    %109 = vector.broadcast %cst_25 : f32 to vector<1x128xf32>
    %110 = arith.mulf %109, %108 : vector<1x128xf32>
    %111 = arith.mulf %92, %92 : vector<1x128xf32>
    %112 = arith.addf %110, %111 : vector<1x128xf32>
    %113 = arith.mulf %94, %94 : vector<1x128xf32>
    %114 = arith.mulf %96, %96 : vector<1x128xf32>
    %115 = arith.addf %113, %114 : vector<1x128xf32>
    %cst_26 = arith.constant 5.000000e-01 : f32
    %116 = vector.broadcast %cst_26 : f32 to vector<1x128xf32>
    %117 = arith.mulf %116, %115 : vector<1x128xf32>
    %118 = arith.addf %112, %117 : vector<1x128xf32>
    %119 = arith.mulf %101, %101 : vector<20x128xf32>
    %cst_27 = arith.constant dense<0.000000e+00> : vector<128xf32>
    %120 = vector.multi_reduction <add>, %119, %cst_27 [0] : vector<20x128xf32> to vector<128xf32>
    %121 = vector.shape_cast %120 : vector<128xf32> to vector<1x128xf32>
    %122 = arith.addf %118, %121 : vector<1x128xf32>
    %c0_i32_28 = arith.constant 0 : i32
    %123 = arith.cmpi ne, %arg0, %c0_i32_28 : i32
    %124 = arith.extui %123 : i1 to i32
    %c0_i32_29 = arith.constant 0 : i32
    %125 = arith.cmpi ne, %124, %c0_i32_29 : i32
    scf.if %125 {
      %c0_34 = arith.constant 0 : index
      %c0_35 = arith.constant 0 : index
      %132 = vector.load %arg4[%c0_34, %c0_35] : memref<1x128xf32, #tpu.memory_space<vmem>>, vector<1x128xf32>
      %133 = arith.addf %132, %122 : vector<1x128xf32>
      %c0_36 = arith.constant 0 : index
      %c0_37 = arith.constant 0 : index
      %134 = vector.load %arg4[%c0_36, %c0_37] : memref<1x128xf32, #tpu.memory_space<vmem>>, vector<1x128xf32>
      tpu.vector_store %arg4[%c0_36, %c0_37], %133 {strides = array<i32>} : memref<1x128xf32, #tpu.memory_space<vmem>>, vector<1x128xf32>,
    } else {
    }
    %c0_i32_30 = arith.constant 0 : i32
    %126 = arith.cmpi eq, %arg0, %c0_i32_30 : i32
    %127 = arith.extui %126 : i1 to i32
    %c0_i32_31 = arith.constant 0 : i32
    %128 = arith.cmpi ne, %127, %c0_i32_31 : i32
    scf.if %128 {
      %132 = tpu.iota {dimensions = array<i32: 1>} : vector<1x128xi32>
      %c0_34 = arith.constant 0 : index
      %c0_35 = arith.constant 0 : index
      %133 = vector.load %arg4[%c0_34, %c0_35] : memref<1x128xf32, #tpu.memory_space<vmem>>, vector<1x128xf32>
      %c98_i32 = arith.constant 98 : i32
      %134 = vector.broadcast %c98_i32 : i32 to vector<1x128xi32>
      %135 = arith.cmpi slt, %132, %134 : vector<1x128xi32>
      %cst_36 = arith.constant 0.000000e+00 : f32
      %136 = vector.broadcast %cst_36 : f32 to vector<1x128xf32>
      %137 = arith.select %135, %122, %136 : vector<1x128xi1>, vector<1x128xf32>
      %138 = arith.addf %133, %137 : vector<1x128xf32>
      %c0_37 = arith.constant 0 : index
      %c0_38 = arith.constant 0 : index
      %139 = vector.load %arg4[%c0_37, %c0_38] : memref<1x128xf32, #tpu.memory_space<vmem>>, vector<1x128xf32>
      tpu.vector_store %arg4[%c0_37, %c0_38], %138 {strides = array<i32>} : memref<1x128xf32, #tpu.memory_space<vmem>>, vector<1x128xf32>,
    } else {
    }
    %c0_i32_32 = arith.constant 0 : i32
    %129 = arith.cmpi eq, %arg0, %c0_i32_32 : i32
    %130 = arith.extui %129 : i1 to i32
    %c0_i32_33 = arith.constant 0 : i32
    %131 = arith.cmpi ne, %130, %c0_i32_33 : i32
    scf.if %131 {
      %c0_34 = arith.constant 0 : index
      %c0_35 = arith.constant 0 : index
      %132 = vector.load %arg4[%c0_34, %c0_35] : memref<1x128xf32, #tpu.memory_space<vmem>>, vector<1x128xf32>
      %133 = vector.shape_cast %132 : vector<1x128xf32> to vector<1x1x128xf32>
      %cst_36 = arith.constant dense<0.000000e+00> : vector<1xf32>
      %134 = vector.multi_reduction <add>, %133, %cst_36 [1, 2] : vector<1x1x128xf32> to vector<1xf32>
      %135 = vector.shape_cast %134 : vector<1xf32> to vector<1x1x1xf32>
      %136 = vector.extract %135[0, 0, 0] : f32 from vector<1x1x1xf32>
      %c0_37 = arith.constant 0 : index
      %c0_38 = arith.constant 0 : index
      %137 = memref.load %arg3[%c0_37, %c0_38] : memref<1x1xf32, #tpu.memory_space<smem>>
      memref.store %136, %arg3[%c0_37, %c0_38] : memref<1x1xf32, #tpu.memory_space<smem>>
    } else {
    }
    return
  }
  func.func @transform_0(%arg0: i32) -> (i32, i32) {
    %c0_i32 = arith.constant 0 : i32
    %c0_i32_0 = arith.constant 0 : i32
    return %c0_i32, %arg0 : i32, i32
  }
  func.func @transform_1(%arg0: i32) -> (i32, i32) {
    %c0_i32 = arith.constant 0 : i32
    %c0_i32_0 = arith.constant 0 : i32
    return %c0_i32, %arg0 : i32, i32
  }
  func.func @transform_2(%arg0: i32) -> (i32, i32) {
    %c0_i32 = arith.constant 0 : i32
    %c0_i32_0 = arith.constant 0 : i32
    %c0_i32_1 = arith.constant 0 : i32
    return %c0_i32, %c0_i32_0 : i32, i32
  }
}

</mosaic_0001>

<bundles_post_ra>
// kernel: yolo_loss_channel_major.1
= control target key start
LH: loop header
LB: loop body
LE: loop exit
PB: predicated region body
PF: predicated region fallthrough
CT: control target
= control target key end

     0   :  { %7 = vsyncpa [#allocation4], 0  ;;  %s397_s0 = inlined_call_operand.hbm [shape: f32[30,98], index: 0, kind: input, shape index: {}]   ;;  %s398_s1 = inlined_call_operand.hbm [shape: f32[25,98], index: 1, kind: input, shape index: {}]   ;;  %s399_s2 = inlined_call_operand.hbm [shape: f32[1,1], index: 2, kind: output, shape index: {}]  }
   0x1   :  { %8 = vsyncpa [#allocation7], 0 }
   0x2   :  { %9 = vsyncpa [#allocation5], 0  ;;  %s340_s9 = smov [#allocation3]  }
   0x3   :  { %s15_s10 = sshll.u32 %s340_s9, 4  ;;  %s16_s10 = int_to_ptr.vmem [resolvable:$true] %s15_s10 }
   0x4   :  { %s294_s11 = scalar_lea.vmem %s16_s10, 512  ;;  %p299_p1 = scmp.lt.s32.totalorder %s16_s10, %s16_s10 }
   0x5   :  { %p295_p0 = scmp.ne.s32.totalorder %s16_s10, %s294_s11  ;;  %p300_p2 = scmp.lt.s32.totalorder %s294_s11, %s294_s11 }
   0x7   :  { %p301_p3 = por %p300_p2, %p299_p1 }
   0x9   :  { %p302_p4 = pnand %p301_p3, %p295_p0 }
   0xb   :  { %305 = shalt.err (!%p302_p4)
}
   0xc   :  { %s341_s12 = smov 128   ;;  %s342_s13 = smov 8  }
   0xd   :  { %21 = dma.hbm_to_vmem [thread:$0]  %s397_s0, 512, %s16_s10, [#allocation4], %s341_s12, %s341_s12, %s342_s13  }
   0xe   :  { %s343_s16 = smov [#allocation6]  }
   0xf   :  { %s27_s17 = sshll.u32 %s343_s16, 4  ;;  %s28_s17 = int_to_ptr.vmem [resolvable:$true] %s27_s17 }
  0x10   :  { %s314_s18 = scalar_lea.vmem %s28_s17, 512  ;;  %p319_p6 = scmp.lt.s32.totalorder %s28_s17, %s28_s17 }
  0x11   :  { %p315_p5 = scmp.ne.s32.totalorder %s28_s17, %s314_s18  ;;  %p320_p7 = scmp.lt.s32.totalorder %s314_s18, %s314_s18 }
  0x13   :  { %p321_p8 = por %p320_p7, %p319_p6 }
  0x15   :  { %p322_p9 = pnand %p321_p8, %p315_p5 }
  0x17   :  { %325 = shalt.err (!%p322_p9)
}
  0x18   :  { %33 = dma.hbm_to_vmem [thread:$0]  %s398_s1, 512, %s28_s17, [#allocation7], %s341_s12, %s341_s12, %s342_s13  }
  0x19   :  { %334 = dma.done.wait [#allocation4], 512  }
  0x1a   :  { %335 = vsyncadd [#allocation4], 4294966784 }
  0x1b   :  { %336 = dma.done.wait [#allocation7], 512  }
  0x1c   :  { %337 = vsyncadd [#allocation7], 4294966784  ;;  %v344_v0 = vmov 0.0   ;;  %v46_v1 = vld [vmem:[#allocation6 + $0x15] sm:$0xf]  ;;  %vm60_vm0 = vcmask 1041408   ;;  %v114_v37 = vlaneseq }
  0x1d   :  { %44 = vst [vmem:[#allocation2] sm:$0x1] %v344_v0  ;;  %v47_v2 = vld [vmem:[#allocation3 + $0x15] sm:$0xf]  ;;  %v48_v3 = vld [vmem:[#allocation3 + $0x1a] sm:$0xf] }
  0x1e   :  { %v51_v4 = vmul.f32 0.5, %v46_v1  ;;  %v67_v5 = vrot.slane %v48_v3, 6  ;;  %v71_v6 = vrot.slane %v47_v2, 2  ;;  %v92_v17 = vrot.slane %v48_v3, 1  ;;  %v374_v44 = vld [vmem:[#allocation6 + $0x14] sm:$0x1] }
  0x1f   :  { %v86_v22 = vrot.slane %v46_v1, 1  ;;  %v89_v23 = vrot.slane %v47_v2, 1  ;;  %v115_v39 = vshrl.u32 %v114_v37, 7  ;;  %v345_v49 = vmov 0   ;;  %v169_v57 = vld [vmem:[#allocation3] sm:$0xff]  ;;  %v170_v58 = vld [vmem:[#allocation3 + $0x8] sm:$0xff] }
  0x20   :  { %v53_v7 = vrot.slane %v51_v4, 2  ;;  %v69_v8 = vsel %vm60_vm0, %v47_v2, %v67_v5  ;;  %v73_v9 = vsel %vm60_vm0, %v71_v6, %v48_v3  ;;  %v94_v25 = vmul.f32 %v92_v17, %v48_v3  ;;  %v172_v59 = vld [vmem:[#allocation6] sm:$0xff]  ;;  %v173_v60 = vld [vmem:[#allocation6 + $0x8] sm:$0xff]  ;;  %v171_v61 = vld [vmem:[#allocation3 + $0x10] sm:$0xf]  ;;  %s346_s1 = smov [#allocation8]  }
  0x21   :  { %v74_v10 = vmul.f32 0.5, %v73_v9  ;;  %v88_v27 = vmul.f32 %v86_v22, %v46_v1  ;;  %v91_v28 = vmul.f32 %v89_v23, %v47_v2  ;;  %v122_v43 = vsub.s32 0, %v115_v39  ;;  %v174_v62 = vld [vmem:[#allocation6 + $0x10] sm:$0xf] }
  0x22   :  { %v55_v11 = vsub.f32 %v46_v1, %v53_v7  ;;  %v56_v12 = vadd.f32 %v53_v7, %v46_v1  ;;  %v116_v46 = vsub.s32 2, %v115_v39  ;;  %v175_v63 = vsub.f32 %v169_v57, %v172_v59 }
  0x23   :  { %v75_v13 = vsub.f32 %v69_v8, %v74_v10  ;;  %v76_v14 = vadd.f32 %v74_v10, %v69_v8  ;;  %v105_v30 = vadd.f32 %v94_v25, %v88_v27  ;;  %v95_v32 = vadd.f32 %v91_v28, %v88_v27  ;;  %v49_v25 = vld [vmem:[#allocation3 + $0x14] sm:$0x1] }
  0x24   :  { %v58_v15 = vrot.slane %v55_v11, 6  ;;  %v63_v16 = vrot.slane %v56_v12, 6  ;;  %v123_v48 = vrot.slane %v374_v44, %v122_v43  ;;  %v176_v4 = vsub.f32 %v170_v58, %v173_v60 }
  0x25   :  { %v177_v6 = vsub.f32 %v171_v61, %v174_v62  ;;  %vm213_vm7 = vcmask 1043456   ;;  %vm241_vm11 = vcmask 1040384  }
  0x26   :  { %v61_v18 = vsel %vm60_vm0, %v55_v11, %v58_v15  ;;  %v65_v19 = vsel %vm60_vm0, %v56_v12, %v63_v16  ;;  %v125_v52 = vmul.f32 %v123_v48, %v46_v1  ;;  %v178_v8 = vmul.f32 %v175_v63, %v123_v48 }
  0x27   :  { %v77_v20 = vmin.f32 %v76_v14, %v65_v19  ;;  %v78_v21 = vmax.f32 %v75_v13, %v61_v18  ;;  %v179_v1 = vmul.f32 %v176_v4, %v123_v48  ;;  %v180_v9 = vmul.f32 %v177_v6, %v123_v48 }
  0x28   :  { %vm143_vm4 = vcmp.eq.f32.partialorder %v125_v52, inf  ;;  %v209_v10 = vmul.f32 %v178_v8, %v178_v8  ;;  %v146_v17 = vand.u32 2147483648, %v125_v52  ;;  %vm145_vm9 = vcmp.eq.f32.partialorder %v125_v52, 0.0 }
  0x29   :  { %v79_v24 = vsub.f32 %v77_v20, %v78_v21  ;;  %v210_v11 = vmul.f32 %v179_v1, %v179_v1  ;;  %v211_v14 = vmul.f32 %v180_v9, %v180_v9 }
  0x2b   :  { %v80_v26 = vmax.f32 %v79_v24, 0.0  ;;  %v212_v22 = vadd.f32 %v210_v11, %v209_v10  ;;  %v214_v24 = vsel %vm213_vm7, %v211_v14, 0.0 }
  0x2d   :  { %v82_v29 = vrot.slane %v80_v26, 1 }
  0x2f   :  { %v84_v31 = vmul.f32 %v82_v29, %v80_v26  ;;  %v50_v26 = vld [vmem:[#allocation3 + $0x19] sm:$0x1] }
  0x30   :  { %v167_v43 = vsub.f32 %v50_v26, %v374_v44 }
  0x31   :  { %v97_v33 = vrot.slane %v84_v31, 6  ;;  %v106_v34 = vsub.f32 %v105_v30, %v84_v31  ;;  %v215_v30 = vadd.f32 %v214_v24, %v212_v22 }
  0x33   :  { %v99_v35 = vsub.f32 %v95_v32, %v97_v33  ;;  %278 = vrcp.f32 %v106_v34  ;;  %v151_v32 = vrot.slane %v50_v26, 6  ;;  %v154_v33 = vrot.slane %v49_v25, 6 }
  0x35   :  { %v101_v36 = vrot.slane %v99_v35, 2  ;;  %v158_v35 = vrot.slane %v374_v44, 6 }
  0x37   :  { %280 = vrcp.f32 %v101_v36 }
  0x38   :  { %282 = vrsqrt.f32 %v125_v52 }
  0x40   :  { %v279_v38 = vpop.eup %278 }
  0x41   :  { %v108_v42 = vmul.f32 %v279_v38, %v84_v31  ;;  %v216_v38 = vrot.slane %v215_v30, 4 }
  0x44   :  { %v281_v40 = vpop.eup %280 }
  0x45   :  { %v104_v41 = vmul.f32 %v281_v40, %v84_v31  ;;  %v283_v7 = vpop.eup %282 }
  0x47   :  { %v110_v45 = vrot.slane %v104_v41, 6  ;;  %v149_v41 = vsub.f32 1.0, %v374_v44 }
  0x49   :  { %vm376_vm1 = vcmp.gt.f32.partialorder %v108_v42, %v110_v45  ;;  %v165_v42 = vsub.f32 %v49_v25, %v374_v44 }
  0x4a   :  { %v113_v50 = vsel %vm376_vm1, 1, %v345_v49  ;;  %v156_v39 = vsel %vm376_vm1, %v151_v32, %v154_v33 }
  0x4b   :  { %v117_v51 = vrot.slane %v113_v50, %v116_v46  ;;  %v160_v46 = vsub.f32 %v156_v39, %v158_v35  ;;  %v217_v50 = vadd.f32 %v216_v38, %v215_v30 }
  0x4d   :  { %vm118_vm2 = vcmp.eq.s32.totalorder %v117_v51, 1  ;;  %v166_v51 = vmul.f32 %v165_v42, %v149_v41 }
  0x4e   :  { %v119_v53 = vsel %vm118_vm2, %v48_v3, %v47_v2  ;;  %v142_v3 = vmul.f32 %v283_v7, %v125_v52 }
  0x4f   :  { %v124_v54 = vmul.f32 %v123_v48, %v119_v53  ;;  %v204_v58 = vmul.f32 %v166_v51, %v166_v51 }
  0x50   :  { %v144_v19 = vsel %vm143_vm4, %v125_v52, %v142_v3 }
  0x51   :  { %v131_v55 = vadd.f32 1e-06, %v124_v54  ;;  %v130_v5 = vsub.f32 %v124_v54, %v125_v52  ;;  %vm127_vm3 = vcmp.lt.f32.partialorder %v124_v54, 0.0  ;;  %vm126_vm5 = vcmp.gt.f32.partialorder %v124_v54, 0.0 }
  0x52   :  { %v128_v12 = vsel %vm127_vm3, -1.0, %v344_v0  ;;  %v147_v27 = vsel %vm145_vm9, %v146_v17, %v144_v19  ;;  %v168_v52 = vmul.f32 %v167_v43, %v149_v41  ;;  %v162_v54 = vrot.slane %v160_v46, 2 }
  0x53   :  { %v132_v56 = vand.u32 2147483647, %v131_v55  ;;  %v181_v2 = vmul.f32 %v130_v5, %v130_v5  ;;  %v129_v20 = vsel %vm126_vm5, 1.0, %v128_v12 }
  0x54   :  { %v205_v59 = vmul.f32 %v168_v52, %v168_v52  ;;  %v164_v60 = vmul.f32 %v162_v54, %v374_v44 }
  0x55   :  { %284 = vrsqrt.f32 %v132_v56  ;;  %v182_v13 = vsel %vm60_vm0, %v181_v2, 0.0  ;;  %vm135_vm6 = vcmp.eq.f32.partialorder %v132_v56, inf  ;;  %v138_v16 = vand.u32 2147483648, %v132_v56 }
  0x56   :  { %vm137_vm8 = vcmp.eq.f32.partialorder %v132_v56, 0.0  ;;  %v183_v21 = vrot.slane %v182_v13, 4  ;;  %v206_v5 = vadd.f32 %v205_v59, %v204_v58  ;;  %v202_v7 = vmul.f32 %v164_v60, %v164_v60 }
  0x57   :  { %v234_v2 = vand.u32 127, %v114_v37 }
  0x58   :  { %v184_v29 = vadd.f32 %v183_v21, %v182_v13  ;;  %v207_v9 = vmul.f32 0.5, %v206_v5  ;;  %v235_v13 = vld [vmem:[#allocation2] sm:$0x1] }
  0x59   :  { %vm236_vm10 = vcmp.lt.s32.totalorder %v234_v2, 98 }
  0x5a   :  { %v185_v36 = vrot.slane %v184_v29, 2 }
  0x5c   :  { %v186_v48 = vadd.f32 %v185_v36, %v184_v29 }
  0x5e   :  { %v187_v55 = vrot.slane %v186_v48, 1 }
  0x60   :  { %v188_v61 = vadd.f32 %v187_v55, %v186_v48 }
  0x62   :  { %v285_v15 = vpop.eup %284 }
  0x63   :  { %v134_v18 = vmul.f32 %v285_v15, %v132_v56 }
  0x65   :  { %v136_v23 = vsel %vm135_vm6, %v132_v56, %v134_v18  ;;  %v218_v56 = vrot.slane %v217_v50, 2 }
  0x66   :  { %v139_v0 = vsel %vm137_vm8, %v138_v16, %v136_v23 }
  0x67   :  { %v140_v28 = vmul.f32 %v139_v0, %v129_v20  ;;  %v219_v63 = vadd.f32 %v218_v56, %v217_v50 }
  0x69   :  { %v148_v31 = vsub.f32 %v140_v28, %v147_v27  ;;  %v220_v8 = vrot.slane %v219_v63, 1 }
  0x6b   :  { %v189_v34 = vmul.f32 %v148_v31, %v148_v31  ;;  %v221_v10 = vadd.f32 %v220_v8, %v219_v63 }
  0x6d   :  { %v191_v40 = vrot.slane %v189_v34, 2 }
  0x6f   :  { %v193_v45 = vsel %vm60_vm0, %v191_v40, 0.0 }
  0x70   :  { %v194_v49 = vrot.slane %v193_v45, 4 }
  0x72   :  { %v195_v53 = vadd.f32 %v194_v49, %v193_v45 }
  0x74   :  { %v196_v47 = vrot.slane %v195_v53, 2 }
  0x76   :  { %v197_v57 = vadd.f32 %v196_v47, %v195_v53 }
  0x78   :  { %v198_v62 = vrot.slane %v197_v57, 1 }
  0x7a   :  { %v199_v4 = vadd.f32 %v198_v62, %v197_v57 }
  0x7c   :  { %v200_v6 = vadd.f32 %v199_v4, %v188_v61 }
  0x7e   :  { %v201_v1 = vmul.f32 5.0, %v200_v6 }
  0x80   :  { %v203_v3 = vadd.f32 %v202_v7, %v201_v1 }
  0x82   :  { %v208_v11 = vadd.f32 %v207_v9, %v203_v3 }
  0x84   :  { %v222_v12 = vadd.f32 %v221_v10, %v208_v11 }
  0x86   :  { %v237_v14 = vsel %vm236_vm10, %v222_v12, 0.0 }
  0x87   :  { %v238_v44 = vadd.f32 %v237_v14, %v235_v13 }
  0x89   :  { %239 = vst [vmem:[#allocation2] sm:$0x1] %v238_v44 }
  0x90   :  { %v240_v15 = vld [vmem:[#allocation2] sm:$0x1] }
  0x91   :  { %v242_v16 = vsel %vm241_vm11, %v240_v15, 0.0 }
  0x92   :  { %243 = vadd.xlane.f32.xlu0 %v242_v16 }
 0x11b   :  { %v244_v17 = vpop.xlane.xlu0 %243 }
 0x11c   :  { %v245_v18 = vrot.slane %v244_v17, 4 }
 0x11e   :  { %v246_v19 = vadd.f32 %v245_v18, %v244_v17 }
 0x120   :  { %v247_v20 = vrot.slane %v246_v19, 2 }
 0x122   :  { %v248_v21 = vadd.f32 %v247_v20, %v246_v19 }
 0x124   :  { %v249_v22 = vrot.slane %v248_v21, 1 }
 0x126   :  { %v250_v37 = vadd.f32 %v249_v22, %v248_v21 }
 0x128   :  { %269 = vpush %v250_v37 }
 0x159   :  { %s270_s0 = spop %269 }
 0x15a   :  { %253 = sst [smem:[#allocation8]] %s270_s0 }
 0x15b   :  { %261 = dma.smem_to_hbm %s346_s1, 16, %s399_s2, [#allocation5]  }
 0x15c   :  { %338 = dma.done.wait [#allocation5], 16  }
 0x15d   :  { %339 = vsyncadd [#allocation5], 4294967280 }
 0x15e   :  { %265 = sfence }
 0x15f   :  { %266 = vsyncpa [#allocation4], 1 }
 0x160   :  { %267 = vsyncpa [#allocation7], 1 }
 0x161   :  { %268 = vsyncpa [#allocation5], 1 }

</bundles_post_ra>
